<compile_context>
chip_gen: v5e
topology: v5e:2x2
jax: 0.10.0
libtpu: 0.0.40
codegen_flags: <defaults>
</compile_context>

<pallas_src>
import functools

import jax
import jax.numpy as jnp
from jax.experimental import pallas as pl
from jax.experimental.pallas import tpu as pltpu

FOLD = 4  # batch rows folded into the lane dim (4 * hidden=64 -> 256-wide MXU)


def _round_up(n, m):
    return ((n + m - 1) // m) * m


def _cdiv(a, b):
    return -(-a // b)


def _mlp_kernel(x_ref, w1_ref, b1_ref, w2_ref, b2_ref, w3_ref, b3_ref, o_ref):
    # Fused 3-layer MLP on one folded batch tile: bf16 operands into the MXU,
    # f32 accumulation, f32 bias-add + ReLU on the VPU.  Weights arrive
    # pre-packed (block-diagonal, bf16), biases pre-tiled along lanes.
    x = x_ref[...].astype(jnp.bfloat16)

    h1 = jnp.dot(x, w1_ref[...], preferred_element_type=jnp.float32) + b1_ref[...]
    h1 = jnp.maximum(h1, 0.0).astype(jnp.bfloat16)

    h2 = jnp.dot(h1, w2_ref[...], preferred_element_type=jnp.float32) + b2_ref[...]
    h2 = jnp.maximum(h2, 0.0).astype(jnp.bfloat16)

    out = jnp.dot(h2, w3_ref[...], preferred_element_type=jnp.float32) + b3_ref[...]
    o_ref[...] = out.astype(o_ref.dtype)


@functools.partial(jax.jit, static_argnames=("fold", "batch_tile"))
def fully_connected_forward(x, packed, *, fold=FOLD, batch_tile=4096):
    """Fused MLP forward as a single Pallas kernel over folded batch tiles.

    x:      [B, input_size] float32
    packed: dict of fold-packed params (see pack_params):
            w1 [fold*in, fold*64], b1 [1, fold*64],
            w2 [fold*64, fold*64], b2 [1, fold*64],
            w3 [fold*64, fold*out], b3 [1, fold*out]
    """
    w1, b1 = packed["w1"], packed["b1"]
    w2, b2 = packed["w2"], packed["b2"]
    w3, b3 = packed["w3"], packed["b3"]

    B, d_in = x.shape
    k1, n1 = w1.shape
    n2 = w2.shape[1]
    n3 = w3.shape[1]
    d_out = n3 // fold
    out_dtype = x.dtype
    assert k1 == fold * d_in, "packed w1 does not match fold * input_size"

    # --- tiling over folded rows: minimal number of equal grid steps, each a
    #     multiple of 8 folded rows, capped at batch_tile/fold original rows.
    #     Padding waste is <= 8*steps - 1 folded rows (tiny), not tile-1.
    rows_f = _cdiv(B, fold)                      # folded rows needed
    max_tile_f = max(8, batch_tile // fold)      # folded rows per grid step cap
    g = max(1, _cdiv(rows_f, max_tile_f))        # grid steps
    tile_f = _round_up(_cdiv(rows_f, g), 8)      # folded rows per step (8-aligned)
    rows_f_pad = g * tile_f
    b_pad = rows_f_pad * fold

    if b_pad != B:
        x = jnp.pad(x, ((0, b_pad - B), (0, 0)))
    # Contiguous fold-4 reshape: rows 4i..4i+3 concatenate along lanes.
    x_f = x.reshape(rows_f_pad, fold * d_in)

    out_f = pl.pallas_call(
        _mlp_kernel,
        out_shape=jax.ShapeDtypeStruct((rows_f_pad, n3), out_dtype),
        grid=(g,),
        in_specs=[
            pl.BlockSpec((tile_f, fold * d_in), lambda i: (i, 0)),  # x (pipelined)
            pl.BlockSpec((k1, n1), lambda i: (0, 0)),               # w1 (resident)
            pl.BlockSpec((1, n1), lambda i: (0, 0)),                # b1
            pl.BlockSpec((n1, n2), lambda i: (0, 0)),               # w2
            pl.BlockSpec((1, n2), lambda i: (0, 0)),                # b2
            pl.BlockSpec((n2, n3), lambda i: (0, 0)),               # w3
            pl.BlockSpec((1, n3), lambda i: (0, 0)),                # b3
        ],
        out_specs=pl.BlockSpec((tile_f, n3), lambda i: (i, 0)),
        compiler_params=pltpu.CompilerParams(
            dimension_semantics=("parallel",),
        ),
    )(x_f, w1, b1, w2, b2, w3, b3)

    # Contiguous unfold back to per-row outputs, drop padded rows.
    out = out_f.reshape(b_pad, d_out)
    if b_pad != B:
        out = out[:B]
    return out


def init_params(key, input_size, output_size, hidden=64):
    """Deterministic init mirroring nn.Linear's U(-1/sqrt(fan_in), 1/sqrt(fan_in)).

    Weights stored [in_features, out_features] (transposed from PyTorch's
    [out, in]) in bfloat16 (MXU-native); biases float32, shape [1, out]."""
    keys = jax.random.split(key, 6)

    def linear(kw, kb, fan_in, fan_out):
        bound = 1.0 / jnp.sqrt(jnp.float32(fan_in))
        w = jax.random.uniform(kw, (fan_in, fan_out), jnp.float32, -bound, bound)
        b = jax.random.uniform(kb, (1, fan_out), jnp.float32, -bound, bound)
        return w.astype(jnp.bfloat16), b

    w1, b1 = linear(keys[0], keys[1], input_size, hidden)
    w2, b2 = linear(keys[2], keys[3], hidden, hidden)
    w3, b3 = linear(keys[4], keys[5], hidden, output_size)
    return {"w1": w1, "b1": b1, "w2": w2, "b2": b2, "w3": w3, "b3": b3}


def pack_params(params, fold=FOLD):
    """Pack weights block-diagonally and tile biases for the fold-N kernel.

    Off-diagonal blocks are exact zeros, so the folded math equals the
    original per-row MLP exactly."""

    def block_diag(w):
        fi, fo = w.shape
        out = jnp.zeros((fold * fi, fold * fo), dtype=w.dtype)
        for i in range(fold):
            out = out.at[i * fi:(i + 1) * fi, i * fo:(i + 1) * fo].set(w)
        return out

    return {
        "w1": block_diag(params["w1"]), "b1": jnp.tile(params["b1"], (1, fold)),
        "w2": block_diag(params["w2"]), "b2": jnp.tile(params["b2"], (1, fold)),
        "w3": block_diag(params["w3"]), "b3": jnp.tile(params["b3"], (1, fold)),
    }


def reference_forward(x, params):
    # Mirrors the kernel's dtype policy: bf16 operands, f32 accumulation.
    h1 = jnp.dot(x.astype(jnp.bfloat16), params["w1"],
                 preferred_element_type=jnp.float32) + params["b1"]
    h1 = jnp.maximum(h1, 0.0).astype(jnp.bfloat16)
    h2 = jnp.dot(h1, params["w2"],
                 preferred_element_type=jnp.float32) + params["b2"]
    h2 = jnp.maximum(h2, 0.0).astype(jnp.bfloat16)
    out = jnp.dot(h2, params["w3"],
                  preferred_element_type=jnp.float32) + params["b3"]
    return out.astype(x.dtype)


if __name__ == "__main__":
    key = jax.random.PRNGKey(0)
    k_param, k_x = jax.random.split(key)

    batch = 8
    input_size = 32
    output_size = 16

    params = init_params(k_param, input_size, output_size)
    packed = pack_params(params)
    x = jax.random.normal(k_x, (batch, input_size), dtype=jnp.float32)

    y = fully_connected_forward(x, packed)
    y = jax.block_until_ready(y)

    y_ref = reference_forward(x, params)
    assert y.shape == (batch, output_size)
    assert jnp.allclose(y, y_ref, atol=1e-2, rtol=1e-2), "mismatch vs reference"

    print("KERNEL_OK")
</pallas_src>

<mosaic_0001>
module attributes {stable_mosaic.version = 11 : i64} {
  func.func @_mlp_kernel(%arg0: i32, %arg1: memref<8x128xf32, #tpu.memory_space<vmem>>, %arg2: memref<128x256xbf16, #tpu.memory_space<vmem>>, %arg3: memref<1x256xf32, #tpu.memory_space<vmem>>, %arg4: memref<256x256xbf16, #tpu.memory_space<vmem>>, %arg5: memref<1x256xf32, #tpu.memory_space<vmem>>, %arg6: memref<256x64xbf16, #tpu.memory_space<vmem>>, %arg7: memref<1x64xf32, #tpu.memory_space<vmem>>, %arg8: memref<8x64xf32, #tpu.memory_space<vmem>>) attributes {dimension_semantics = [#tpu.dimension_semantics<parallel>], iteration_bounds = array<i64: 1>, scalar_prefetch = 0 : i64, scratch_operands = 0 : i64, tpu.core_type = #tpu.core_type<tc>, window_params = [{transform_indices = @transform_0, window_bounds = array<i64: 8, 128>}, {pipeline_mode = #tpu.pipeline_mode<synchronous>, transform_indices = @transform_1, window_bounds = array<i64: 128, 256>}, {pipeline_mode = #tpu.pipeline_mode<synchronous>, transform_indices = @transform_2, window_bounds = array<i64: 1, 256>}, {pipeline_mode = #tpu.pipeline_mode<synchronous>, transform_indices = @transform_3, window_bounds = array<i64: 256, 256>}, {pipeline_mode = #tpu.pipeline_mode<synchronous>, transform_indices = @transform_4, window_bounds = array<i64: 1, 256>}, {pipeline_mode = #tpu.pipeline_mode<synchronous>, transform_indices = @transform_5, window_bounds = array<i64: 256, 64>}, {pipeline_mode = #tpu.pipeline_mode<synchronous>, transform_indices = @transform_6, window_bounds = array<i64: 1, 64>}, {transform_indices = @transform_7, window_bounds = array<i64: 8, 64>}]} {
    %c0 = arith.constant 0 : index
    %c0_0 = arith.constant 0 : index
    %0 = vector.load %arg1[%c0, %c0_0] : memref<8x128xf32, #tpu.memory_space<vmem>>, vector<8x128xf32>
    %1 = arith.truncf %0 : vector<8x128xf32> to vector<8x128xbf16>
    %c0_1 = arith.constant 0 : index
    %c0_2 = arith.constant 0 : index
    %2 = vector.load %arg2[%c0_1, %c0_2] : memref<128x256xbf16, #tpu.memory_space<vmem>>, vector<128x256xbf16>
    %cst = arith.constant dense<0.000000e+00> : vector<8x256xf32>
    %3 = tpu.matmul %1, %2, %cst {dimension_numbers = #tpu.dot_dimension_numbers<[1], [0], [0], [1], [0, 0, 1, 1], [], []>} : vector<8x128xbf16>, vector<128x256xbf16>, vector<8x256xf32> -> vector<8x256xf32>
    %c0_3 = arith.constant 0 : index
    %c0_4 = arith.constant 0 : index
    %4 = vector.load %arg3[%c0_3, %c0_4] : memref<1x256xf32, #tpu.memory_space<vmem>>, vector<1x256xf32>
    %5 = vector.broadcast %4 : vector<1x256xf32> to vector<8x256xf32>
    %6 = arith.addf %3, %5 : vector<8x256xf32>
    %cst_5 = arith.constant 0.000000e+00 : f32
    %7 = vector.broadcast %cst_5 : f32 to vector<8x256xf32>
    %8 = arith.maximumf %6, %7 : vector<8x256xf32>
    %9 = arith.truncf %8 : vector<8x256xf32> to vector<8x256xbf16>
    %c0_6 = arith.constant 0 : index
    %c0_7 = arith.constant 0 : index
    %10 = vector.load %arg4[%c0_6, %c0_7] : memref<256x256xbf16, #tpu.memory_space<vmem>>, vector<256x256xbf16>
    %cst_8 = arith.constant dense<0.000000e+00> : vector<8x256xf32>
    %11 = tpu.matmul %9, %10, %cst_8 {dimension_numbers = #tpu.dot_dimension_numbers<[1], [0], [0], [1], [0, 0, 1, 1], [], []>} : vector<8x256xbf16>, vector<256x256xbf16>, vector<8x256xf32> -> vector<8x256xf32>
    %c0_9 = arith.constant 0 : index
    %c0_10 = arith.constant 0 : index
    %12 = vector.load %arg5[%c0_9, %c0_10] : memref<1x256xf32, #tpu.memory_space<vmem>>, vector<1x256xf32>
    %13 = vector.broadcast %12 : vector<1x256xf32> to vector<8x256xf32>
    %14 = arith.addf %11, %13 : vector<8x256xf32>
    %cst_11 = arith.constant 0.000000e+00 : f32
    %15 = vector.broadcast %cst_11 : f32 to vector<8x256xf32>
    %16 = arith.maximumf %14, %15 : vector<8x256xf32>
    %17 = arith.truncf %16 : vector<8x256xf32> to vector<8x256xbf16>
    %c0_12 = arith.constant 0 : index
    %c0_13 = arith.constant 0 : index
    %18 = vector.load %arg6[%c0_12, %c0_13] : memref<256x64xbf16, #tpu.memory_space<vmem>>, vector<256x64xbf16>
    %cst_14 = arith.constant dense<0.000000e+00> : vector<8x64xf32>
    %19 = tpu.matmul %17, %18, %cst_14 {dimension_numbers = #tpu.dot_dimension_numbers<[1], [0], [0], [1], [0, 0, 1, 1], [], []>} : vector<8x256xbf16>, vector<256x64xbf16>, vector<8x64xf32> -> vector<8x64xf32>
    %c0_15 = arith.constant 0 : index
    %c0_16 = arith.constant 0 : index
    %20 = vector.load %arg7[%c0_15, %c0_16] : memref<1x64xf32, #tpu.memory_space<vmem>>, vector<1x64xf32>
    %21 = vector.broadcast %20 : vector<1x64xf32> to vector<8x64xf32>
    %22 = arith.addf %19, %21 : vector<8x64xf32>
    %c0_17 = arith.constant 0 : index
    %c0_18 = arith.constant 0 : index
    %23 = vector.load %arg8[%c0_17, %c0_18] : memref<8x64xf32, #tpu.memory_space<vmem>>, vector<8x64xf32>
    tpu.vector_store %arg8[%c0_17, %c0_18], %22 {strides = array<i32>} : memref<8x64xf32, #tpu.memory_space<vmem>>, vector<8x64xf32>,
    return
  }
  func.func @transform_0(%arg0: i32) -> (i32, i32) {
    %c0_i32 = arith.constant 0 : i32
    %c0_i32_0 = arith.constant 0 : i32
    return %arg0, %c0_i32 : i32, i32
  }
  func.func @transform_1(%arg0: i32) -> (i32, i32) {
    %c0_i32 = arith.constant 0 : i32
    %c0_i32_0 = arith.constant 0 : i32
    %c0_i32_1 = arith.constant 0 : i32
    return %c0_i32, %c0_i32_0 : i32, i32
  }
  func.func @transform_2(%arg0: i32) -> (i32, i32) {
    %c0_i32 = arith.constant 0 : i32
    %c0_i32_0 = arith.constant 0 : i32
    %c0_i32_1 = arith.constant 0 : i32
    return %c0_i32, %c0_i32_0 : i32, i32
  }
  func.func @transform_3(%arg0: i32) -> (i32, i32) {
    %c0_i32 = arith.constant 0 : i32
    %c0_i32_0 = arith.constant 0 : i32
    %c0_i32_1 = arith.constant 0 : i32
    return %c0_i32, %c0_i32_0 : i32, i32
  }
  func.func @transform_4(%arg0: i32) -> (i32, i32) {
    %c0_i32 = arith.constant 0 : i32
    %c0_i32_0 = arith.constant 0 : i32
    %c0_i32_1 = arith.constant 0 : i32
    return %c0_i32, %c0_i32_0 : i32, i32
  }
  func.func @transform_5(%arg0: i32) -> (i32, i32) {
    %c0_i32 = arith.constant 0 : i32
    %c0_i32_0 = arith.constant 0 : i32
    %c0_i32_1 = arith.constant 0 : i32
    return %c0_i32, %c0_i32_0 : i32, i32
  }
  func.func @transform_6(%arg0: i32) -> (i32, i32) {
    %c0_i32 = arith.constant 0 : i32
    %c0_i32_0 = arith.constant 0 : i32
    %c0_i32_1 = arith.constant 0 : i32
    return %c0_i32, %c0_i32_0 : i32, i32
  }
  func.func @transform_7(%arg0: i32) -> (i32, i32) {
    %c0_i32 = arith.constant 0 : i32
    %c0_i32_0 = arith.constant 0 : i32
    return %arg0, %c0_i32 : i32, i32
  }
}

</mosaic_0001>

<bundles_post_ra>
// kernel: fully_connected_forward.1
= control target key start
LH: loop header
LB: loop body
LE: loop exit
PB: predicated region body
PF: predicated region fallthrough
CT: control target
= control target key end

     0   :  { %12 = vsyncpa [#allocation3], 0  ;;  %s945_s27 = smov [#allocation2]   ;;  %s946_s29 = smov 128   ;;  %s1150_s0 = inlined_call_operand.vmem [shape: f32[8,128], index: 0, kind: input, shape index: {}]   ;;  %s1151_s1 = inlined_call_operand.vmem [shape: bf16[128,256], index: 1, kind: input, shape index: {}]   ;;  %s1152_s2 = inlined_call_operand.vmem [shape: f32[1,256], index: 2, kind: input, shape index: {}]   ;;  %s1153_s3 = inlined_call_operand.hbm [shape: bf16[256,256], index: 3, kind: input, shape index: {}]   ;;  %s1154_s4 = inlined_call_operand.vmem [shape: f32[1,256], index: 4, kind: input, shape index: {}]   ;;  %s1155_s5 = inlined_call_operand.vmem [shape: bf16[256,64], index: 5, kind: input, shape index: {}]   ;;  %s1156_s6 = inlined_call_operand.vmem [shape: f32[1,64], index: 6, kind: input, shape index: {}]   ;;  %s1157_s7 = inlined_call_operand.vmem [shape: f32[8,64], index: 7, kind: output, shape index: {}]  }
   0x1   :  { %s23_s26 = sshll.u32 %s1153_s3, 4  ;;  %s25_s28 = sshll.u32 %s945_s27, 4  ;;  %s24_s26 = int_to_ptr.hbm [resolvable:$true] %s23_s26  ;;  %s26_s28 = int_to_ptr.vmem [resolvable:$true] %s25_s28 }
   0x2   :  { %s947_s30 = smov 8  }
   0x3   :  { %31 = dma.hbm_to_vmem [thread:$0]  %s24_s26, 4096, %s26_s28, [#allocation3], %s946_s29, %s946_s29, %s947_s30  }
   0x4   :  { %943 = dma.done.wait [#allocation3], 4096  }
   0x5   :  { %944 = vsyncadd [#allocation3], 4294963200  ;;  %v653_v0 = vld [vmem:[%s1151_s1 + $0x70] sm:$0xf]  ;;  %v866_v1 = vld [vmem:[%s1151_s1 + $0x74] sm:$0xf0] }
   0x6   :  { %v865_v2 = vld [vmem:[%s1151_s1 + $0x74] sm:$0xf]  ;;  %v654_v3 = vor.u32 %v866_v1, %v653_v0  ;;  %v655_v4 = vld [vmem:[%s1151_s1 + $0x78] sm:$0xf0]  ;;  %v645_v5 = vld [vmem:[%s1151_s1 + $0x60] sm:$0xf] }
   0x7   :  { %v864_v6 = vld [vmem:[%s1151_s1 + $0x64] sm:$0xf0]  ;;  %v658_v7 = vor.u32 %v865_v2, %v655_v4  ;;  %v863_v8 = vld [vmem:[%s1151_s1 + $0x64] sm:$0xf]  ;;  %v647_v9 = vld [vmem:[%s1151_s1 + $0x68] sm:$0xf0] }
   0x8   :  { %146 = vmatpush.bf16.msra.mxu0 %v654_v3  ;;  %v646_v10 = vor.u32 %v864_v6, %v645_v5  ;;  %v650_v11 = vor.u32 %v863_v8, %v647_v9  ;;  %v637_v12 = vld [vmem:[%s1151_s1 + $0x50] sm:$0xf]  ;;  %v862_v13 = vld [vmem:[%s1151_s1 + $0x54] sm:$0xf0]  ;;  %v861_v14 = vld [vmem:[%s1151_s1 + $0x54] sm:$0xf] }
   0x9   :  { %159 = vmatpush.bf16.msra.mxu1 %v658_v7  ;;  %v639_v15 = vld [vmem:[%s1151_s1 + $0x58] sm:$0xf0]  ;;  %v638_v16 = vor.u32 %v862_v13, %v637_v12  ;;  %v629_v18 = vld [vmem:[%s1151_s1 + $0x40] sm:$0xf]  ;;  %v860_v19 = vld [vmem:[%s1151_s1 + $0x44] sm:$0xf0] }
   0xa   :  { %v642_v17 = vor.u32 %v861_v14, %v639_v15  ;;  %v859_v20 = vld [vmem:[%s1151_s1 + $0x44] sm:$0xf]  ;;  %v631_v21 = vld [vmem:[%s1151_s1 + $0x48] sm:$0xf0]  ;;  %v630_v22 = vor.u32 %v860_v19, %v629_v18  ;;  %v717_v23 = vld [vmem:[#allocation2 + $0x70] sm:$0xf] }
   0xb   :  { %v882_v24 = vld [vmem:[#allocation2 + $0x74] sm:$0xf0]  ;;  %v781_v25 = vld [vmem:[#allocation2 + $0xf0] sm:$0xf]  ;;  %v634_v26 = vor.u32 %v859_v20, %v631_v21  ;;  %v857_v31 = vld [vmem:[%s1151_s1 + $0x34] sm:$0xf] }
   0xc   :  { %147 = vmatpush.bf16.msra.mxu0 %v646_v10  ;;  %v621_v27 = vld [vmem:[%s1151_s1 + $0x30] sm:$0xf]  ;;  %v858_v28 = vld [vmem:[%s1151_s1 + $0x34] sm:$0xf0]  ;;  %v718_v29 = vor.u32 %v882_v24, %v717_v23  ;;  %v623_v32 = vld [vmem:[%s1151_s1 + $0x38] sm:$0xf0] }
   0xd   :  { %160 = vmatpush.bf16.msra.mxu1 %v650_v11  ;;  %v898_v30 = vld [vmem:[#allocation2 + $0xf4] sm:$0xf0]  ;;  %v709_v34 = vld [vmem:[#allocation2 + $0x60] sm:$0xf]  ;;  %v880_v35 = vld [vmem:[#allocation2 + $0x64] sm:$0xf0]  ;;  %v622_v38 = vor.u32 %v858_v28, %v621_v27  ;;  %v626_v43 = vor.u32 %v857_v31, %v623_v32 }
   0xe   :  { %v782_v33 = vor.u32 %v898_v30, %v781_v25  ;;  %374 = vmatpush.bf16.msra.mxu2 %v718_v29  ;;  %v773_v36 = vld [vmem:[#allocation2 + $0xe0] sm:$0xf]  ;;  %v896_v37 = vld [vmem:[#allocation2 + $0xe4] sm:$0xf0]  ;;  %v710_v41 = vor.u32 %v880_v35, %v709_v34  ;;  %v855_v44 = vld [vmem:[%s1151_s1 + $0x24] sm:$0xf] }
   0xf   :  { %v613_v39 = vld [vmem:[%s1151_s1 + $0x20] sm:$0xf]  ;;  %v856_v40 = vld [vmem:[%s1151_s1 + $0x24] sm:$0xf0]  ;;  %v774_v42 = vor.u32 %v896_v37, %v773_v36  ;;  %v701_v45 = vld [vmem:[#allocation2 + $0x50] sm:$0xf] }
  0x10   :  { %148 = vmatpush.bf16.msra.mxu0 %v638_v16  ;;  %387 = vmatpush.bf16.msra.mxu3 %v782_v33  ;;  %v878_v46 = vld [vmem:[#allocation2 + $0x54] sm:$0xf0]  ;;  %v615_v47 = vld [vmem:[%s1151_s1 + $0x28] sm:$0xf0]  ;;  %v765_v48 = vld [vmem:[#allocation2 + $0xd0] sm:$0xf]  ;;  %v614_v51 = vor.u32 %v856_v40, %v613_v39 }
  0x11   :  { %161 = vmatpush.bf16.msra.mxu1 %v642_v17  ;;  %v894_v49 = vld [vmem:[#allocation2 + $0xd4] sm:$0xf0]  ;;  %v702_v50 = vor.u32 %v878_v46, %v701_v45  ;;  %v605_v52 = vld [vmem:[%s1151_s1 + $0x10] sm:$0xf]  ;;  %v693_v54 = vld [vmem:[#allocation2 + $0x40] sm:$0xf]  ;;  %v618_v56 = vor.u32 %v855_v44, %v615_v47 }
  0x12   :  { %375 = vmatpush.bf16.msra.mxu2 %v710_v41  ;;  %v766_v53 = vor.u32 %v894_v49, %v765_v48  ;;  %v876_v55 = vld [vmem:[#allocation2 + $0x44] sm:$0xf0]  ;;  %v854_v57 = vld [vmem:[%s1151_s1 + $0x14] sm:$0xf0]  ;;  %v757_v58 = vld [vmem:[#allocation2 + $0xc0] sm:$0xf] }
  0x13   :  { %v892_v59 = vld [vmem:[#allocation2 + $0xc4] sm:$0xf0]  ;;  %v853_v60 = vld [vmem:[%s1151_s1 + $0x14] sm:$0xf]  ;;  %v607_v61 = vld [vmem:[%s1151_s1 + $0x18] sm:$0xf0]  ;;  %v694_v63 = vor.u32 %v876_v55, %v693_v54  ;;  %v606_v0 = vor.u32 %v854_v57, %v605_v52 }
  0x14   :  { %149 = vmatpush.bf16.msra.mxu0 %v630_v22  ;;  %388 = vmatpush.bf16.msra.mxu3 %v774_v42  ;;  %v597_v62 = vld [vmem:[%s1151_s1] sm:$0xf]  ;;  %v852_v1 = vld [vmem:[%s1151_s1 + $0x4] sm:$0xf0]  ;;  %v758_v2 = vor.u32 %v892_v59, %v757_v58  ;;  %v685_v3 = vld [vmem:[#allocation2 + $0x30] sm:$0xf]  ;;  %v610_v5 = vor.u32 %v853_v60, %v607_v61 }
  0x15   :  { %162 = vmatpush.bf16.msra.mxu1 %v634_v26  ;;  %v874_v4 = vld [vmem:[#allocation2 + $0x34] sm:$0xf0]  ;;  %v851_v6 = vld [vmem:[%s1151_s1 + $0x4] sm:$0xf]  ;;  %v749_v7 = vld [vmem:[#allocation2 + $0xb0] sm:$0xf]  ;;  %v598_v16 = vor.u32 %v852_v1, %v597_v62 }
  0x16   :  { %376 = vmatpush.bf16.msra.mxu2 %v702_v50  ;;  %v890_v8 = vld [vmem:[#allocation2 + $0xb4] sm:$0xf0]  ;;  %v599_v9 = vld [vmem:[%s1151_s1 + $0x8] sm:$0xf0]  ;;  %v881_v10 = vld [vmem:[#allocation2 + $0x74] sm:$0xf]  ;;  %v686_v15 = vor.u32 %v874_v4, %v685_v3 }
  0x17   :  { %v719_v11 = vld [vmem:[#allocation2 + $0x78] sm:$0xf0]  ;;  %v42_v12 = vld [vmem:[%s1150_s0] sm:$0xff]  ;;  %v897_v13 = vld [vmem:[#allocation2 + $0xf4] sm:$0xf]  ;;  %v750_v17 = vor.u32 %v890_v8, %v749_v7  ;;  %v602_v20 = vor.u32 %v851_v6, %v599_v9  ;;  %vm588_vm0 = vcmask 523264  }
  0x18   :  { %150 = vmatpush.bf16.msra.mxu0 %v622_v38  ;;  %389 = vmatpush.bf16.msra.mxu3 %v766_v53  ;;  %v783_v14 = vld [vmem:[#allocation2 + $0xf8] sm:$0xf0]  ;;  %v677_v18 = vld [vmem:[#allocation2 + $0x20] sm:$0xf]  ;;  %v872_v19 = vld [vmem:[#allocation2 + $0x24] sm:$0xf0]  ;;  %v722_v21 = vor.u32 %v881_v10, %v719_v11  ;;  %v43_v27 = vpack.c.bf16 %v42_v12, %v42_v12 }
  0x19   :  { %163 = vmatpush.bf16.msra.mxu1 %v626_v43  ;;  %v741_v22 = vld [vmem:[#allocation2 + $0xa0] sm:$0xf]  ;;  %v888_v23 = vld [vmem:[#allocation2 + $0xa4] sm:$0xf0]  ;;  %v786_v24 = vor.u32 %v897_v13, %v783_v14  ;;  %v879_v25 = vld [vmem:[#allocation2 + $0x64] sm:$0xf]  ;;  %v678_v30 = vor.u32 %v872_v19, %v677_v18 }
  0x1a   :  { %377 = vmatpush.bf16.msra.mxu2 %v694_v63  ;;  %v711_v26 = vld [vmem:[#allocation2 + $0x68] sm:$0xf0]  ;;  %v895_v28 = vld [vmem:[#allocation2 + $0xe4] sm:$0xf]  ;;  %v742_v31 = vor.u32 %v888_v23, %v741_v22  ;;  %v877_v34 = vld [vmem:[#allocation2 + $0x54] sm:$0xf] }
  0x1b   :  { %v775_v29 = vld [vmem:[#allocation2 + $0xe8] sm:$0xf0]  ;;  %v714_v32 = vor.u32 %v879_v25, %v711_v26  ;;  %v703_v35 = vld [vmem:[#allocation2 + $0x58] sm:$0xf0]  ;;  %v893_v36 = vld [vmem:[#allocation2 + $0xd4] sm:$0xf] }
  0x1c   :  { %151 = vmatpush.bf16.msra.mxu0 %v614_v51  ;;  %390 = vmatpush.bf16.msra.mxu3 %v758_v2  ;;  %v778_v33 = vor.u32 %v895_v28, %v775_v29  ;;  %v767_v37 = vld [vmem:[#allocation2 + $0xd8] sm:$0xf0]  ;;  %v706_v38 = vor.u32 %v877_v34, %v703_v35  ;;  %v875_v40 = vld [vmem:[#allocation2 + $0x44] sm:$0xf]  ;;  %v695_v41 = vld [vmem:[#allocation2 + $0x48] sm:$0xf0] }
  0x1d   :  { %164 = vmatpush.bf16.msra.mxu1 %v618_v56  ;;  %v770_v39 = vor.u32 %v893_v36, %v767_v37  ;;  %v891_v42 = vld [vmem:[#allocation2 + $0xc4] sm:$0xf]  ;;  %v759_v43 = vld [vmem:[#allocation2 + $0xc8] sm:$0xf0]  ;;  %v698_v44 = vor.u32 %v875_v40, %v695_v41  ;;  %v873_v46 = vld [vmem:[#allocation2 + $0x34] sm:$0xf] }
  0x1e   :  { %378 = vmatpush.bf16.msra.mxu2 %v686_v15  ;;  %v762_v45 = vor.u32 %v891_v42, %v759_v43  ;;  %v687_v47 = vld [vmem:[#allocation2 + $0x38] sm:$0xf0]  ;;  %v889_v48 = vld [vmem:[#allocation2 + $0xb4] sm:$0xf]  ;;  %v871_v52 = vld [vmem:[#allocation2 + $0x24] sm:$0xf] }
  0x1f   :  { %v751_v49 = vld [vmem:[#allocation2 + $0xb8] sm:$0xf0]  ;;  %v690_v50 = vor.u32 %v873_v46, %v687_v47  ;;  %v679_v53 = vld [vmem:[#allocation2 + $0x28] sm:$0xf0]  ;;  %v887_v54 = vld [vmem:[#allocation2 + $0xa4] sm:$0xf] }
  0x20   :  { %152 = vmatpush.bf16.msra.mxu0 %v606_v0  ;;  %391 = vmatpush.bf16.msra.mxu3 %v750_v17  ;;  %v754_v51 = vor.u32 %v889_v48, %v751_v49  ;;  %v743_v55 = vld [vmem:[#allocation2 + $0xa8] sm:$0xf0]  ;;  %v682_v56 = vor.u32 %v871_v52, %v679_v53  ;;  %v669_v58 = vld [vmem:[#allocation2 + $0x10] sm:$0xf]  ;;  %v870_v59 = vld [vmem:[#allocation2 + $0x14] sm:$0xf0] }
  0x21   :  { %165 = vmatpush.bf16.msra.mxu1 %v610_v5  ;;  %v746_v57 = vor.u32 %v887_v54, %v743_v55  ;;  %v733_v60 = vld [vmem:[#allocation2 + $0x90] sm:$0xf]  ;;  %v670_v61 = vor.u32 %v870_v59, %v669_v58  ;;  %v886_v62 = vld [vmem:[#allocation2 + $0x94] sm:$0xf0]  ;;  %v869_v63 = vld [vmem:[#allocation2 + $0x14] sm:$0xf] }
  0x22   :  { %379 = vmatpush.bf16.msra.mxu2 %v678_v30  ;;  %v671_v0 = vld [vmem:[#allocation2 + $0x18] sm:$0xf0]  ;;  %v734_v1 = vor.u32 %v886_v62, %v733_v60  ;;  %v885_v3 = vld [vmem:[#allocation2 + $0x94] sm:$0xf]  ;;  %v661_v6 = vld [vmem:[#allocation2] sm:$0xf] }
  0x23   :  { %v674_v2 = vor.u32 %v869_v63, %v671_v0  ;;  %v735_v4 = vld [vmem:[#allocation2 + $0x98] sm:$0xf0]  ;;  %v868_v7 = vld [vmem:[#allocation2 + $0x4] sm:$0xf0]  ;;  %v725_v8 = vld [vmem:[#allocation2 + $0x80] sm:$0xf] }
  0x24   :  { %153 = vmatpush.bf16.msra.mxu0 %v598_v16  ;;  %392 = vmatpush.bf16.msra.mxu3 %v742_v31  ;;  %v738_v5 = vor.u32 %v885_v3, %v735_v4  ;;  %v662_v9 = vor.u32 %v868_v7, %v661_v6  ;;  %v884_v10 = vld [vmem:[#allocation2 + $0x84] sm:$0xf0]  ;;  %v867_v11 = vld [vmem:[#allocation2 + $0x4] sm:$0xf]  ;;  %v663_v12 = vld [vmem:[#allocation2 + $0x8] sm:$0xf0] }
  0x25   :  { %166 = vmatpush.bf16.msra.mxu1 %v602_v20  ;;  %v726_v13 = vor.u32 %v884_v10, %v725_v8  ;;  %v666_v14 = vor.u32 %v867_v11, %v663_v12  ;;  %v883_v15 = vld [vmem:[#allocation2 + $0x84] sm:$0xf]  ;;  %v727_v16 = vld [vmem:[#allocation2 + $0x88] sm:$0xf0]  ;;  %v914_v18 = vld [vmem:[%s1155_s5 + $0x78] sm:$0xff] }
  0x26   :  { %380 = vmatpush.bf16.msra.mxu2 %v670_v61  ;;  %v730_v17 = vor.u32 %v883_v15, %v727_v16  ;;  %v906_v19 = vld [vmem:[%s1155_s5 + $0x38] sm:$0xff]  ;;  %v913_v20 = vld [vmem:[%s1155_s5 + $0x70] sm:$0xff]  ;;  %v912_v22 = vld [vmem:[%s1155_s5 + $0x68] sm:$0xff] }
  0x27   :  { %154 = vmatmul.bf16.vlgmr.msra.gmra.mxu0 %v43_v27  ;;  %v904_v23 = vld [vmem:[%s1155_s5 + $0x28] sm:$0xff]  ;;  %v903_v25 = vld [vmem:[%s1155_s5 + $0x20] sm:$0xff]  ;;  %v910_v26 = vld [vmem:[%s1155_s5 + $0x58] sm:$0xff] }
  0x28   :  { %400 = vmatpush.bf16.msrb.mxu0 %v722_v21  ;;  %167 = vmatmul.bf16.vlgmr.msra.gmra.mxu1 %v43_v27  ;;  %v905_v21 = vld [vmem:[%s1155_s5 + $0x30] sm:$0xff]  ;;  %v60_v27 = vld [vmem:[%s1152_s2] sm:$0x3]  ;;  %v902_v41 = vld [vmem:[%s1155_s5 + $0x18] sm:$0xff] }
  0x29   :  { %413 = vmatpush.bf16.msrb.mxu1 %v786_v24  ;;  %393 = vmatpush.bf16.msra.mxu3 %v734_v1  ;;  %v911_v24 = vld [vmem:[%s1155_s5 + $0x60] sm:$0xff]  ;;  %v909_v28 = vld [vmem:[%s1155_s5 + $0x50] sm:$0xff]  ;;  %v62_v29 = vperm.slane %v60_v27, 0  ;;  %v63_v30 = vperm.slane %v60_v27, 1  ;;  %v908_v42 = vld [vmem:[%s1155_s5 + $0x48] sm:$0xff] }
  0x2a   :  { %381 = vmatpush.bf16.msra.mxu2 %v662_v9  ;;  %v901_v43 = vld [vmem:[%s1155_s5 + $0x10] sm:$0xff]  ;;  %v899_v46 = vld [vmem:[%s1155_s5] sm:$0xff] }
  0x2b   :  { %v208_v47 = vld [vmem:[%s1154_s4] sm:$0x3] }
  0x2c   :  { %401 = vmatpush.bf16.msrb.mxu0 %v714_v32  ;;  %v211_v48 = vperm.slane %v208_v47, 1  ;;  %v210_v53 = vperm.slane %v208_v47, 0  ;;  %v918_v3 = vld [vmem:[%s1156_s6] ss:$0 sm:$0xff] }
  0x2d   :  { %414 = vmatpush.bf16.msrb.mxu1 %v778_v33  ;;  %394 = vmatpush.bf16.msra.mxu3 %v726_v13 }
  0x2e   :  { %562 = vmatpush.bf16.msrb.mxu2 %v906_v19 }
  0x30   :  { %402 = vmatpush.bf16.msrb.mxu0 %v706_v38 }
  0x31   :  { %415 = vmatpush.bf16.msrb.mxu1 %v770_v39  ;;  %575 = vmatpush.bf16.msrb.mxu3 %v914_v18 }
  0x32   :  { %563 = vmatpush.bf16.msrb.mxu2 %v905_v21 }
  0x34   :  { %403 = vmatpush.bf16.msrb.mxu0 %v698_v44  ;;  %v907_v44 = vld [vmem:[%s1155_s5 + $0x40] sm:$0xff] }
  0x35   :  { %416 = vmatpush.bf16.msrb.mxu1 %v762_v45  ;;  %576 = vmatpush.bf16.msrb.mxu3 %v913_v20  ;;  %v900_v45 = vld [vmem:[%s1155_s5 + $0x8] sm:$0xff] }
  0x36   :  { %564 = vmatpush.bf16.msrb.mxu2 %v904_v23 }
  0x38   :  { %404 = vmatpush.bf16.msrb.mxu0 %v690_v50 }
  0x39   :  { %417 = vmatpush.bf16.msrb.mxu1 %v754_v51  ;;  %577 = vmatpush.bf16.msrb.mxu3 %v912_v22 }
  0x3a   :  { %565 = vmatpush.bf16.msrb.mxu2 %v903_v25 }
  0x3c   :  { %405 = vmatpush.bf16.msrb.mxu0 %v682_v56 }
  0x3d   :  { %418 = vmatpush.bf16.msrb.mxu1 %v746_v57  ;;  %578 = vmatpush.bf16.msrb.mxu3 %v911_v24 }
  0x3e   :  { %566 = vmatpush.bf16.msrb.mxu2 %v902_v41 }
  0x40   :  { %406 = vmatpush.bf16.msrb.mxu0 %v674_v2 }
  0x41   :  { %419 = vmatpush.bf16.msrb.mxu1 %v738_v5  ;;  %579 = vmatpush.bf16.msrb.mxu3 %v910_v26 }
  0x42   :  { %567 = vmatpush.bf16.msrb.mxu2 %v901_v43 }
  0x44   :  { %407 = vmatpush.bf16.msrb.mxu0 %v666_v14 }
  0x45   :  { %420 = vmatpush.bf16.msrb.mxu1 %v730_v17  ;;  %580 = vmatpush.bf16.msrb.mxu3 %v909_v28 }
  0x46   :  { %568 = vmatpush.bf16.msrb.mxu2 %v900_v45 }
  0x49   :  { %581 = vmatpush.bf16.msrb.mxu3 %v908_v42 }
  0x4a   :  { %569 = vmatpush.bf16.msrb.mxu2 %v899_v46 }
  0x4d   :  { %582 = vmatpush.bf16.msrb.mxu3 %v907_v44 }
  0xa4   :  { %v155_v31 = vpop.f32.mrf.mxu0 }
  0xa5   :  { %v156_v32 = vadd.f32 %v155_v31, %v62_v29  ;;  %v168_v33 = vpop.f32.mrf.mxu1 }
  0xa6   :  { %v169_v34 = vadd.f32 %v168_v33, %v63_v30 }
  0xa7   :  { %v172_v35 = vmax.f32 %v156_v32, 0.0 }
  0xa8   :  { %v173_v36 = vmax.f32 %v169_v34, 0.0 }
  0xa9   :  { %v174_v37 = vpack.c.bf16 %v172_v35, %v172_v35 }
  0xaa   :  { %v175_v38 = vpack.c.bf16 %v173_v36, %v173_v36 }
  0xab   :  { %382 = vmatmul.bf16.vlgmr.msra.gmra.mxu2 %v174_v37  ;;  %408 = vmatmul.bf16.vlgmr.msrb.gmra.mxu0 %v174_v37 }
  0xac   :  { %395 = vmatmul.bf16.vlgmr.msra.gmra.mxu3 %v175_v38  ;;  %421 = vmatmul.bf16.vlgmr.msrb.gmra.mxu1 %v175_v38  ;;  %v157_v39 = vpop.f32.mrf.mxu0 }
  0xad   :  { %v170_v40 = vpop.f32.mrf.mxu1 }
 0x128   :  { %v409_v49 = vpop.f32.mrf.mxu0 }
 0x129   :  { %v410_v50 = vadd.f32 %v409_v49, %v211_v48  ;;  %v422_v51 = vpop.f32.mrf.mxu1 }
 0x12b   :  { %v423_v52 = vadd.f32 %v422_v51, %v410_v50 }
 0x12d   :  { %v427_v54 = vmax.f32 %v423_v52, 0.0 }
 0x12e   :  { %v383_v55 = vpop.f32.mrf.mxu2 }
 0x12f   :  { %v429_v56 = vpack.c.bf16 %v427_v54, %v427_v54  ;;  %v384_v57 = vadd.f32 %v383_v55, %v210_v53  ;;  %v396_v58 = vpop.f32.mrf.mxu3 }
 0x130   :  { %v411_v59 = vpop.f32.mrf.mxu0 }
 0x131   :  { %v397_v60 = vadd.f32 %v396_v58, %v384_v57  ;;  %v424_v61 = vpop.f32.mrf.mxu1  ;;  %583 = vmatmul.bf16.vlgmr.msrb.gmra.mxu3 %v429_v56 }
 0x133   :  { %v426_v62 = vmax.f32 %v397_v60, 0.0 }
 0x135   :  { %v428_v63 = vpack.c.bf16 %v426_v62, %v426_v62 }
 0x136   :  { %v385_v0 = vpop.f32.mrf.mxu2 }
 0x137   :  { %v398_v1 = vpop.f32.mrf.mxu3  ;;  %570 = vmatmul.bf16.vlgmr.msrb.gmra.mxu2 %v428_v63 }
 0x1b4   :  { %v584_v2 = vpop.f32.mrf.mxu3 }
 0x1ba   :  { %v571_v4 = vpop.f32.mrf.mxu2 }
 0x1bb   :  { %v572_v5 = vadd.f32 %v918_v3, %v571_v4 }
 0x1bc   :  { %v586_v6 = vpop.f32.mrf.mxu3 }
 0x1bd   :  { %v585_v7 = vadd.f32 %v584_v2, %v572_v5 }
 0x1bf   :  { %589 = vst.msk [vmem:[%s1157_s7] sm:$0xff] %vm588_vm0, %v585_v7 }
 0x1c2   :  { %v573_v8 = vpop.f32.mrf.mxu2 }
 0x1c3   :  { %594 = vsyncpa [#allocation3], 1 }

</bundles_post_ra>
